<compile_context>
chip_gen: v7x
topology: tpu7x:2x2x1
jax: 0.10.0
libtpu: 0.0.40
codegen_flags: <defaults>
</compile_context>

<pallas_src>
import functools
import math

import jax
import jax.numpy as jnp
from jax.experimental import pallas as pl
from jax.experimental.pallas import tpu as pltpu


# ----------------------------------------------------------------------------
# Kernel: the whole MLP for one tile of rows (all layers fused in one body)
# ----------------------------------------------------------------------------
def _mlp_kernel(*refs, num_layers, matmul_dtype):
    """refs = (x_ref, w_0, b_0, w_1, b_1, ..., w_{L-1}, b_{L-1}, o_ref)."""
    x_ref = refs[0]
    o_ref = refs[-1]

    h = x_ref[...].astype(matmul_dtype)                   # (tm, d_in)
    for i in range(num_layers):
        w = refs[1 + 2 * i][...]                          # (K_i, N_i), pre-cast in wrapper
        b = refs[2 + 2 * i][...]                          # (1,  N_i), f32
        h = jnp.dot(h, w, preferred_element_type=jnp.float32) + b
        if i < num_layers - 1:
            # ReLU in f32, then cast once for the next MXU op (no-op in f32 mode).
            h = jnp.maximum(h, 0.0).astype(matmul_dtype)
    o_ref[...] = h.astype(o_ref.dtype)


# ----------------------------------------------------------------------------
# VMEM accounting ((8,128)-padding aware) and tile selection
# ----------------------------------------------------------------------------
def _round_up(x, m):
    return ((x + m - 1) // m) * m


def _padded_bytes(rows, cols, itemsize=4):
    """VMEM bytes of a (rows, cols) buffer after (8, 128) sublane/lane tiling."""
    return _round_up(max(rows, 1), 8) * _round_up(max(cols, 1), 128) * itemsize


def _estimate_vmem_bytes(tm, d_in, d_out, widths, layer_shapes, w_itemsize=4):
    # Grid-invariant weights/biases are still double-buffered by the default pipeline.
    w_bytes = sum(_padded_bytes(k, n, w_itemsize) for k, n in layer_shapes)
    b_bytes = sum(_padded_bytes(1, n) for _, n in layer_shapes)
    # Streamed row tiles (input + output), double-buffered.
    io_bytes = 2 * (_padded_bytes(tm, d_in) + _padded_bytes(tm, d_out))
    # Live f32 activations inside the fused body (allow two live at once).
    act_bytes = 2 * _padded_bytes(tm, max(widths))
    return io_bytes + 2 * (w_bytes + b_bytes) + act_bytes


def _vmem_budget_and_limit():
    """Generation-aware VMEM budget for tiling and compiler vmem limit."""
    try:
        cap = int(pltpu.get_tpu_info().vmem_capacity_bytes)
    except Exception:
        cap = 64 * 1024 * 1024          # conservative fallback: v7x (64 MiB / TC)
    budget = (cap * 2) // 5             # ~40% for our buffers, headroom for compiler scratch
    limit = min((cap * 3) // 4, 128 * 1024 * 1024)
    return budget, limit


def _select_row_tile(M, d_in, d_out, widths, layer_shapes, budget, *,
                     min_row_blocks=2, max_rows_per_block=8192, w_itemsize=4):
    # Cap so the grid has at least `min_row_blocks` steps (feeds both v7x TCs),
    # but never below the 8-row sublane granule.
    cap = max(8, _round_up(pl.cdiv(M, max(min_row_blocks, 1)), 8))
    tm = _round_up(min(max_rows_per_block, cap), 8)
    while tm > 8 and _estimate_vmem_bytes(tm, d_in, d_out, widths,
                                          layer_shapes, w_itemsize) > budget:
        tm = _round_up(max(tm // 2, 8), 8)
    if tm >= M:
        tm = M                          # single full-extent block (always legal)
    return tm


# ----------------------------------------------------------------------------
# Wrapper
# ----------------------------------------------------------------------------
def mlp_forward(x, params, *, use_bf16_matmul=False, min_row_blocks=2,
                max_rows_per_block=8192):
    """x: (..., input_dim); params: list of (w: (K, N), b: (N,)) per layer.

    use_bf16_matmul=True is recommended on v6e/v7x (and works on v5e's MXU);
    default is f32 so numerics match the PyTorch reference exactly.
    """
    num_layers = len(params)
    shp = x.shape
    d_in = shp[-1]
    d_out = params[-1][0].shape[1]
    layer_shapes = [tuple(w.shape) for (w, _) in params]
    widths = [d_in] + [n for (_, n) in layer_shapes]

    x2 = x.reshape(-1, d_in)
    M = x2.shape[0]

    w_dtype = jnp.bfloat16 if use_bf16_matmul else jnp.float32
    w_itemsize = 2 if use_bf16_matmul else 4

    budget, vmem_limit = _vmem_budget_and_limit()
    tm = _select_row_tile(M, d_in, d_out, widths, layer_shapes, budget,
                          min_row_blocks=min_row_blocks,
                          max_rows_per_block=max_rows_per_block,
                          w_itemsize=w_itemsize)
    grid = (pl.cdiv(M, tm),)

    in_specs = [pl.BlockSpec((tm, d_in), lambda i: (i, 0))]
    flat_args = [x2]
    for (w, b) in params:
        k, n = w.shape
        in_specs.append(pl.BlockSpec((k, n), lambda i: (0, 0)))
        in_specs.append(pl.BlockSpec((1, n), lambda i: (0, 0)))
        flat_args.append(w.astype(w_dtype))                 # hoisted wrapper-side cast
        flat_args.append(b.reshape(1, n).astype(jnp.float32))  # hoisted reshape, f32 bias add

    flops = 2 * M * sum(k * n for (k, n) in layer_shapes)
    bytes_accessed = (x2.size * x2.dtype.itemsize
                      + M * d_out * 4
                      + sum(int(a.size) * a.dtype.itemsize for a in flat_args[1:]))

    out = pl.pallas_call(
        functools.partial(_mlp_kernel, num_layers=num_layers, matmul_dtype=w_dtype),
        grid=grid,
        in_specs=in_specs,
        out_specs=pl.BlockSpec((tm, d_out), lambda i: (i, 0)),
        out_shape=jax.ShapeDtypeStruct((M, d_out), jnp.float32),
        compiler_params=pltpu.CompilerParams(
            dimension_semantics=("parallel",),
            vmem_limit_bytes=vmem_limit,
        ),
        cost_estimate=pl.CostEstimate(
            flops=flops, transcendentals=0, bytes_accessed=bytes_accessed),
    )(*flat_args)
    return out.reshape(shp[:-1] + (d_out,))


# ----------------------------------------------------------------------------
# Pure-JAX reference (for correctness check)
# ----------------------------------------------------------------------------
def mlp_reference(x, params):
    h = x
    for i, (w, b) in enumerate(params):
        h = h @ w + b
        if i < len(params) - 1:
            h = jax.nn.relu(h)
    return h


# ----------------------------------------------------------------------------
if __name__ == "__main__":
    input_dim, hidden_dim, output_dim, num_layers = 32, 64, 4, 3

    key = jax.random.PRNGKey(0)
    dims = [input_dim] + [hidden_dim] * (num_layers - 1) + [output_dim]
    params = []
    for din, dout in zip(dims[:-1], dims[1:]):
        key, kw, kb = jax.random.split(key, 3)
        bound = 1.0 / math.sqrt(din)
        w = jax.random.uniform(kw, (din, dout), jnp.float32, -bound, bound)
        b = jax.random.uniform(kb, (dout,), jnp.float32, -bound, bound)
        params.append((w, b))

    # Small input: (batch=2, queries=8, input_dim=32) -> 2 row blocks of 8
    # (keeps both v7x TensorCores busy even for tiny M).
    key, kx = jax.random.split(key)
    x_small = jax.random.normal(kx, (2, 8, input_dim), jnp.float32)

    # Larger input: exercises the budget-derived row tiling with an uneven tail block.
    key, kx2 = jax.random.split(key)
    x_big = jax.random.normal(kx2, (1000, input_dim), jnp.float32)

    fwd_f32 = jax.jit(mlp_forward)
    fwd_bf16 = jax.jit(functools.partial(mlp_forward, use_bf16_matmul=True))

    y_small = fwd_f32(x_small, params)
    y_big = fwd_f32(x_big, params)
    y_big_bf16 = fwd_bf16(x_big, params)
    jax.block_until_ready((y_small, y_big, y_big_bf16))

    ref_small = mlp_reference(x_small, params)
    ref_big = mlp_reference(x_big, params)

    assert y_small.shape == (2, 8, output_dim)
    assert y_big.shape == (1000, output_dim)
    assert jnp.allclose(y_small, ref_small, atol=1e-4, rtol=1e-4)
    assert jnp.allclose(y_big, ref_big, atol=1e-4, rtol=1e-4)
    # bf16-operand path: looser tolerance vs the f32 reference (f32 accumulation kept).
    assert jnp.allclose(y_big_bf16, ref_big, atol=5e-2, rtol=5e-2)
    print("KERNEL_OK")
</pallas_src>

<mosaic_0001>
module attributes {stable_mosaic.version = 11 : i64} {
  func.func @_mlp_kernel(%arg0: i32, %arg1: memref<8x32xf32, #tpu.memory_space<vmem>>, %arg2: memref<32x64xf32, #tpu.memory_space<vmem>>, %arg3: memref<1x64xf32, #tpu.memory_space<vmem>>, %arg4: memref<64x64xf32, #tpu.memory_space<vmem>>, %arg5: memref<1x64xf32, #tpu.memory_space<vmem>>, %arg6: memref<64x4xf32, #tpu.memory_space<vmem>>, %arg7: memref<1x4xf32, #tpu.memory_space<vmem>>, %arg8: memref<8x4xf32, #tpu.memory_space<vmem>>) attributes {dimension_semantics = [#tpu.dimension_semantics<parallel>], iteration_bounds = array<i64: 2>, scalar_prefetch = 0 : i64, scratch_operands = 0 : i64, tpu.core_type = #tpu.core_type<tc>, window_params = [{transform_indices = @transform_0, window_bounds = array<i64: 8, 32>}, {pipeline_mode = #tpu.pipeline_mode<synchronous>, transform_indices = @transform_1, window_bounds = array<i64: 32, 64>}, {pipeline_mode = #tpu.pipeline_mode<synchronous>, transform_indices = @transform_2, window_bounds = array<i64: 1, 64>}, {pipeline_mode = #tpu.pipeline_mode<synchronous>, transform_indices = @transform_3, window_bounds = array<i64: 64, 64>}, {pipeline_mode = #tpu.pipeline_mode<synchronous>, transform_indices = @transform_4, window_bounds = array<i64: 1, 64>}, {pipeline_mode = #tpu.pipeline_mode<synchronous>, transform_indices = @transform_5, window_bounds = array<i64: 64, 4>}, {pipeline_mode = #tpu.pipeline_mode<synchronous>, transform_indices = @transform_6, window_bounds = array<i64: 1, 4>}, {transform_indices = @transform_7, window_bounds = array<i64: 8, 4>}]} {
    %c0 = arith.constant 0 : index
    %c0_0 = arith.constant 0 : index
    %0 = vector.load %arg1[%c0, %c0_0] : memref<8x32xf32, #tpu.memory_space<vmem>>, vector<8x32xf32>
    %c0_1 = arith.constant 0 : index
    %c0_2 = arith.constant 0 : index
    %1 = vector.load %arg2[%c0_1, %c0_2] : memref<32x64xf32, #tpu.memory_space<vmem>>, vector<32x64xf32>
    %c0_3 = arith.constant 0 : index
    %c0_4 = arith.constant 0 : index
    %2 = vector.load %arg3[%c0_3, %c0_4] : memref<1x64xf32, #tpu.memory_space<vmem>>, vector<1x64xf32>
    %cst = arith.constant dense<0.000000e+00> : vector<8x64xf32>
    %3 = tpu.matmul %0, %1, %cst {dimension_numbers = #tpu.dot_dimension_numbers<[1], [0], [0], [1], [0, 0, 1, 1], [], []>} : vector<8x32xf32>, vector<32x64xf32>, vector<8x64xf32> -> vector<8x64xf32>
    %4 = vector.broadcast %2 : vector<1x64xf32> to vector<8x64xf32>
    %5 = arith.addf %3, %4 : vector<8x64xf32>
    %cst_5 = arith.constant 0.000000e+00 : f32
    %6 = vector.broadcast %cst_5 : f32 to vector<8x64xf32>
    %7 = arith.maximumf %5, %6 : vector<8x64xf32>
    %c0_6 = arith.constant 0 : index
    %c0_7 = arith.constant 0 : index
    %8 = vector.load %arg4[%c0_6, %c0_7] : memref<64x64xf32, #tpu.memory_space<vmem>>, vector<64x64xf32>
    %c0_8 = arith.constant 0 : index
    %c0_9 = arith.constant 0 : index
    %9 = vector.load %arg5[%c0_8, %c0_9] : memref<1x64xf32, #tpu.memory_space<vmem>>, vector<1x64xf32>
    %cst_10 = arith.constant dense<0.000000e+00> : vector<8x64xf32>
    %10 = tpu.matmul %7, %8, %cst_10 {dimension_numbers = #tpu.dot_dimension_numbers<[1], [0], [0], [1], [0, 0, 1, 1], [], []>} : vector<8x64xf32>, vector<64x64xf32>, vector<8x64xf32> -> vector<8x64xf32>
    %11 = vector.broadcast %9 : vector<1x64xf32> to vector<8x64xf32>
    %12 = arith.addf %10, %11 : vector<8x64xf32>
    %cst_11 = arith.constant 0.000000e+00 : f32
    %13 = vector.broadcast %cst_11 : f32 to vector<8x64xf32>
    %14 = arith.maximumf %12, %13 : vector<8x64xf32>
    %c0_12 = arith.constant 0 : index
    %c0_13 = arith.constant 0 : index
    %15 = vector.load %arg6[%c0_12, %c0_13] : memref<64x4xf32, #tpu.memory_space<vmem>>, vector<64x4xf32>
    %c0_14 = arith.constant 0 : index
    %c0_15 = arith.constant 0 : index
    %16 = vector.load %arg7[%c0_14, %c0_15] : memref<1x4xf32, #tpu.memory_space<vmem>>, vector<1x4xf32>
    %cst_16 = arith.constant dense<0.000000e+00> : vector<8x4xf32>
    %17 = tpu.matmul %14, %15, %cst_16 {dimension_numbers = #tpu.dot_dimension_numbers<[1], [0], [0], [1], [0, 0, 1, 1], [], []>} : vector<8x64xf32>, vector<64x4xf32>, vector<8x4xf32> -> vector<8x4xf32>
    %18 = vector.broadcast %16 : vector<1x4xf32> to vector<8x4xf32>
    %19 = arith.addf %17, %18 : vector<8x4xf32>
    %c0_17 = arith.constant 0 : index
    %c0_18 = arith.constant 0 : index
    %20 = vector.load %arg8[%c0_17, %c0_18] : memref<8x4xf32, #tpu.memory_space<vmem>>, vector<8x4xf32>
    tpu.vector_store %arg8[%c0_17, %c0_18], %19 {strides = array<i32>} : memref<8x4xf32, #tpu.memory_space<vmem>>, vector<8x4xf32>,
    return
  }
  func.func @transform_0(%arg0: i32) -> (i32, i32) {
    %c0_i32 = arith.constant 0 : i32
    %c0_i32_0 = arith.constant 0 : i32
    return %arg0, %c0_i32 : i32, i32
  }
  func.func @transform_1(%arg0: i32) -> (i32, i32) {
    %c0_i32 = arith.constant 0 : i32
    %c0_i32_0 = arith.constant 0 : i32
    %c0_i32_1 = arith.constant 0 : i32
    return %c0_i32, %c0_i32_0 : i32, i32
  }
  func.func @transform_2(%arg0: i32) -> (i32, i32) {
    %c0_i32 = arith.constant 0 : i32
    %c0_i32_0 = arith.constant 0 : i32
    %c0_i32_1 = arith.constant 0 : i32
    return %c0_i32, %c0_i32_0 : i32, i32
  }
  func.func @transform_3(%arg0: i32) -> (i32, i32) {
    %c0_i32 = arith.constant 0 : i32
    %c0_i32_0 = arith.constant 0 : i32
    %c0_i32_1 = arith.constant 0 : i32
    return %c0_i32, %c0_i32_0 : i32, i32
  }
  func.func @transform_4(%arg0: i32) -> (i32, i32) {
    %c0_i32 = arith.constant 0 : i32
    %c0_i32_0 = arith.constant 0 : i32
    %c0_i32_1 = arith.constant 0 : i32
    return %c0_i32, %c0_i32_0 : i32, i32
  }
  func.func @transform_5(%arg0: i32) -> (i32, i32) {
    %c0_i32 = arith.constant 0 : i32
    %c0_i32_0 = arith.constant 0 : i32
    %c0_i32_1 = arith.constant 0 : i32
    return %c0_i32, %c0_i32_0 : i32, i32
  }
  func.func @transform_6(%arg0: i32) -> (i32, i32) {
    %c0_i32 = arith.constant 0 : i32
    %c0_i32_0 = arith.constant 0 : i32
    %c0_i32_1 = arith.constant 0 : i32
    return %c0_i32, %c0_i32_0 : i32, i32
  }
  func.func @transform_7(%arg0: i32) -> (i32, i32) {
    %c0_i32 = arith.constant 0 : i32
    %c0_i32_0 = arith.constant 0 : i32
    return %arg0, %c0_i32 : i32, i32
  }
}

</mosaic_0001>

<bundles_post_ra>
// kernel: mlp_forward.1
= control target key start
LH: loop header
LB: loop body
LE: loop exit
PB: predicated region body
PF: predicated region fallthrough
CT: control target
= control target key end

     0   :  { %12 = vsyncpa [#allocation3], 0  ;;  %s850_s24 = smov 0   ;;  %s973_s0 = inlined_call_operand.vmem [shape: f32[16,32], index: 0, kind: input, shape index: {}]   ;;  %s974_s1 = inlined_call_operand.hbm [shape: f32[32,64], index: 1, kind: input, shape index: {}]   ;;  %s975_s2 = inlined_call_operand.vmem [shape: f32[1,64], index: 2, kind: input, shape index: {}]   ;;  %s976_s3 = inlined_call_operand.vmem [shape: f32[64,64], index: 3, kind: input, shape index: {}]   ;;  %s977_s4 = inlined_call_operand.vmem [shape: f32[1,64], index: 4, kind: input, shape index: {}]   ;;  %s978_s5 = inlined_call_operand.vmem [shape: f32[64,4], index: 5, kind: input, shape index: {}]   ;;  %s979_s6 = inlined_call_operand.vmem [shape: f32[1,4], index: 6, kind: input, shape index: {}]   ;;  %s980_s7 = inlined_call_operand.vmem [shape: f32[16,4], index: 7, kind: output, shape index: {}]  }
   0x1 LB: > { %s856_s25 = sadd.s32 4294967295, %s802_s24   ;;  %p623_p0 = scmp.ge.s32.totalorder %s802_s24, 1  ;;  %s802_s24 = sphi %s850_s24, %s18_s24  }
   0x2   : > { %p201_p1 = scmp.lt.s32.totalorder %s802_s24, 3  ;;  %s804_s26 = smov [#allocation2]  }
   0x3   : > { %s213_s27 = sshll.u32 %s804_s26, 4  ;;  %p981_p3 = scmp.eq.s32.totalorder %s856_s25, 0  ;;  %s214_s27 = int_to_ptr.vmem [resolvable:$true] %s213_s27 }
   0x4   : > { %p860_p2 = pnand %p623_p0, %p201_p1  ;;  %s764_s9 = scalar_lea.hbm %s974_s1, 512 }
   0x5   : > { %p765_p6 = scmp.ne.s32.totalorder %s974_s1, %s764_s9  ;;  %p771_p10 = scmp.lt.u32.totalorder %s764_s9, %s974_s1 }
   0x6   : > { %s983_s28 = scalar_select %p860_p2, 1, 0 }
   0x7   : > { %p744_p4 = pneg %p860_p2 }
   0x9   : > { %p869_p5 = pnand %p981_p3, %p744_p4 }
   0xb   : > { %p766_p7 = pneg %p869_p5 }
   0xd   : > { %p767_p8 = pnand %p766_p7, %p765_p6 }
   0xf   : > { %p768_p9 = pneg %p767_p8 }
  0x11   : > { %p773_p11 = pnand %p771_p10, %p768_p9 }
  0x13   : > { %776 = shalt.err (!%p773_p11)
}
  0x14   : > { %s777_s14 = scalar_lea.vmem %s214_s27, 512  ;;  %p785_p1 = scmp.lt.s32.totalorder %s214_s27, %s214_s27 }
  0x15   : > { %p778_p12 = scmp.ne.s32.totalorder %s214_s27, %s777_s14  ;;  %p786_p4 = scmp.lt.s32.totalorder %s777_s14, %s777_s14 }
  0x17   : > { %p780_p13 = pnand %p778_p12, %p766_p7  ;;  %p787_p3 = por %p786_p4, %p785_p1 }
  0x19   : > { %p781_p0 = pneg %p780_p13 }
  0x1b   : > { %p788_p2 = pnand %p787_p3, %p781_p0 }
  0x1d   : > { %791 = shalt.err (!%p788_p2)
}
  0x1e   : > { %s805_s15 = smov 128   ;;  %s806_s16 = smov 8  }
  0x1f   : > { %747 = dma.hbm_to_vmem [thread:$0]  (!%p869_p5), %s974_s1, 512, %s214_s27, [#allocation3], %s805_s15, %s805_s15, %s806_s16  }
  0x20   : > { %p985_p6 = scmp.ne.s32.totalorder %s983_s28, 0 }
  0x21   : > { %p986_p8 = scmp.eq.s32.totalorder (!%p985_p6), %s856_s25, 0 }
  0x22   : > { %251 = sbr.rel (%p985_p6) target bundleno = 699 (0x2bb), region = 48 }
  0x29   : > { %797 = dma.done.wait (%p986_p8), [#allocation3], 512   ;;  %p987_p7 = pmov %p986_p8 }
  0x2a   : > { %p281_p2 = scmp.lt.s32.totalorder %s856_s25, 1  ;;  %v807_v0 = vmov 0.0|0.0   ;;  %vm808_vm0 = vmmov 0   ;;  %v809_v1 = vmov 0.0   ;;  %v290_v2 = vld [vmem:[#allocation2] sm:$0xff]  ;;  %v291_v3 = vld [vmem:[#allocation2 + $0x8] sm:$0xff] }
  0x2b   : > { %799 = vsyncadd (%p987_p7), [#allocation3], 4294966784  ;;  %710 = vmatprep.subr.bf16.mxu0 %v807_v0  ;;  %669 = vmatprep.mubr.msk.f32.mxu0 %vm808_vm0, %v809_v1  ;;  %v292_v4 = vld [vmem:[#allocation2 + $0x10] sm:$0xff]  ;;  %v711_v5 = vpack.c.bf16 %v291_v3, %v290_v2  ;;  %v293_v6 = vld [vmem:[#allocation2 + $0x18] sm:$0xff]  ;;  %vm301_vm1 = vcmask 261120   ;;  %vm391_vm2 = vcmask 523264  }
  0x2c   : > { %716 = vmatprep.subr.bf16.mxu1 %v807_v0  ;;  %688 = vmatprep.mubr.msk.f32.mxu1 %vm808_vm0, %v809_v1  ;;  %s989_s25 = smov (!%p281_p2, %s856_s25), 1  ;;  %v376_v7 = vld [vmem:[%s976_s3] sm:$0xff]  ;;  %v377_v8 = vld [vmem:[%s976_s3 + $0x8] sm:$0xff]  ;;  %v378_v9 = vld [vmem:[%s976_s3 + $0x10] sm:$0xff]  ;;  %v714_v11 = vpack.c.bf16 %v293_v6, %v292_v4  ;;  %vm554_vm3 = vcmask 31744  }
  0x2d   : > { %s628_s19 = sshll.u32 %s989_s25, 3  ;;  %v379_v10 = vld [vmem:[%s976_s3 + $0x18] sm:$0xff]  ;;  %712 = vmatpush3.bf16.msra.mxu0 %v711_v5  ;;  %v717_v12 = vpack.c.bf16 %v377_v8, %v376_v7  ;;  %v380_v14 = vld [vmem:[%s976_s3 + $0x20] sm:$0xff]  ;;  %v381_v15 = vld [vmem:[%s976_s3 + $0x28] sm:$0xff] }
  0x2e   : > { %713 = vmatprep.subr.bf16.mxu0 %v807_v0  ;;  %s284_s9 = scalar_lea.vmem %s973_s0, %s628_s19  ;;  %v720_v13 = vpack.c.bf16 %v379_v10, %v378_v9  ;;  %v723_v17 = vpack.c.bf16 %v381_v15, %v380_v14  ;;  %v382_v18 = vld [vmem:[%s976_s3 + $0x30] sm:$0xff]  ;;  %v383_v19 = vld [vmem:[%s976_s3 + $0x38] sm:$0xff]  ;;  %v466_v21 = vld [vmem:[%s978_s5] sm:$0xff]  ;;  %s288_s23 = scalar_lea.vmem %s980_s7, %s628_s19 }
  0x2f   : > { %718 = vmatpush3.bf16.msra.mxu1 %v717_v12  ;;  %v289_v16 = vld [vmem:[%s284_s9] sm:$0xff]  ;;  %v726_v20 = vpack.c.bf16 %v383_v19, %v382_v18  ;;  %v467_v22 = vld [vmem:[%s978_s5 + $0x8] sm:$0xff]  ;;  %v468_v23 = vld [vmem:[%s978_s5 + $0x10] sm:$0xff] }
  0x30   : > { %719 = vmatprep.subr.bf16.mxu1 %v807_v0  ;;  %v729_v24 = vpack.c.bf16 %v467_v22, %v466_v21  ;;  %v469_v25 = vld [vmem:[%s978_s5 + $0x18] sm:$0xff]  ;;  %v470_v27 = vld [vmem:[%s978_s5 + $0x20] sm:$0xff]  ;;  %v471_v28 = vld [vmem:[%s978_s5 + $0x28] sm:$0xff] }
  0x31   : > { %715 = vmatpush3.bf16.msra.mxu0 %v714_v11  ;;  %v732_v26 = vpack.c.bf16 %v469_v25, %v468_v23  ;;  %v735_v29 = vpack.c.bf16 %v471_v28, %v470_v27  ;;  %v630_v30 = vld [vmem:[%s975_s2] ss:$0 sm:$0xff]  ;;  %v472_v35 = vld [vmem:[%s978_s5 + $0x30] sm:$0xff]  ;;  %v473_v36 = vld [vmem:[%s978_s5 + $0x38] sm:$0xff] }
  0x32   : > { %728 = vmatprep.subr.bf16.mxu0 %v807_v0  ;;  %v738_v37 = vpack.c.bf16 %v473_v36, %v472_v35  ;;  %v632_v38 = vld [vmem:[%s977_s4] ss:$0 sm:$0xff] }
  0x33   : > { %721 = vmatpush3.bf16.msra.mxu1 %v720_v13  ;;  %v634_v43 = vld [vmem:[%s979_s6] ss:$0 sm:$0xff] }
  0x34   : > { %670 = vmatmul.mubr.msk.f32.vlgmr.msra.gmra.mrb[0].mxu0 %vm301_vm1, %v289_v16  ;;  %722 = vmatprep.subr.bf16.mxu1 %v807_v0 }
  0x35   : > { %707 = vmatprep.mubr.msk.f32.mxu0 %vm808_vm0, %v809_v1  ;;  %730 = vmatpush3.bf16.msra.mxu0 %v729_v24 }
  0x36   : > { %731 = vmatprep.subr.bf16.mxu0 %v807_v0 }
  0x37   : > { %724 = vmatpush3.bf16.msra.mxu1 %v723_v17 }
  0x38   : > { %725 = vmatprep.subr.bf16.mxu1 %v807_v0 }
  0x39   : > { %733 = vmatpush3.bf16.msra.mxu0 %v732_v26 }
  0x3a   : > { %734 = vmatprep.subr.bf16.mxu0 %v807_v0 }
  0x3b   : > { %727 = vmatpush3.bf16.msra.mxu1 %v726_v20 }
  0x3d   : > { %736 = vmatpush3.bf16.msra.mxu0 %v735_v29 }
  0x3e   : > { %737 = vmatprep.subr.bf16.mxu0 %v807_v0 }
  0x41   : > { %739 = vmatpush3.bf16.msra.mxu0 %v738_v37 }
 0x107   : > { %v371_v31 = vpop.f32.mrb[0].mxu0 }
 0x108   : > { %v372_v32 = vadd.f32 %v630_v30, %v371_v31  ;;  %v671_v33 = vpop.f32.mrb[1].mxu0 }
 0x10a   : > { %v375_v34 = vmax.f32 %v372_v32, 0.0 }
 0x10c   : > { %689 = vmatmul.mubr.msk.f32.vlgmr.msra.gmra.mrb[0].mxu1 %vm391_vm2, %v375_v34 }
 0x1df   : > { %v461_v39 = vpop.f32.mrb[0].mxu1 }
 0x1e0   : > { %v462_v40 = vadd.f32 %v632_v38, %v461_v39  ;;  %v690_v41 = vpop.f32.mrb[1].mxu1 }
 0x1e2   : > { %v465_v42 = vmax.f32 %v462_v40, 0.0 }
 0x1e4   : > { %708 = vmatmul.mubr.msk.f32.vlgmr.msra.gmra.mrb[2].mxu0 %vm391_vm2, %v465_v42 }
 0x2b7   : > { %v550_v44 = vpop.f32.mrb[2].mxu0 }
 0x2b8   : > { %v551_v45 = vadd.f32 %v634_v43, %v550_v44  ;;  %v709_v46 = vpop.f32.mrb[3].mxu0 }
 0x2ba   : > { %555 = vst.msk [vmem:[%s288_s23] sm:$0xff] %vm554_vm3, %v551_v45 }
 0x2bb PF: > { %s18_s24 = sadd.s32 1, %s802_s24  }
 0x2bc   : > { %p15_p3 = scmp.ge.s32.totalorder %s18_s24, 4  }
 0x2be   :  { %17 = sbr.rel (!%p15_p3) target bundleno = 1 (0x1), region = 83 }
 0x2c5   :  { %575 = vsyncpa [#allocation3], 1 }
 0x2c6   :  { %577 = vsyncpa [#allocation3 + $0x1], 1 }

</bundles_post_ra>
